<compile_context>
chip_gen: v6e
topology: v6e:2x2x1
jax: 0.10.0
libtpu: 0.0.40
codegen_flags: <defaults>
</compile_context>

<pallas_src>
import math
from functools import partial

import jax
import jax.numpy as jnp
from jax.experimental import pallas as pl
from jax.experimental.pallas import tpu as pltpu


# ------------------------------ helpers -------------------------------------

def _row_tile(n, cap=256):
    """Largest row tile <= cap: the full extent if it fits, otherwise the
    largest multiple of 8 dividing n (ragged tails handled by cdiv grid)."""
    if n <= cap:
        return n
    best = 8
    for t in range(8, cap + 1, 8):
        if n % t == 0:
            best = t
    return best


def _ln_f32(x, g, b, eps):
    """Annotated-Transformer LayerNorm: g*(x-mean)/(std_unbiased + eps) + b,
    computed in f32."""
    d = x.shape[-1]
    mean = jnp.mean(x, axis=-1, keepdims=True)
    var = jnp.sum((x - mean) ** 2, axis=-1, keepdims=True) / (d - 1)
    return g * (x - mean) / (jnp.sqrt(var) + eps) + b


# ----------------------------- Pallas kernels ------------------------------

def _ln_linear_kernel(x_ref, g_ref, b_ref, w_ref, bias_ref, o_ref, *, eps):
    # out = LN(x) @ w + bias     (LN stats in f32, matmul in native dtype)
    x = x_ref[...].astype(jnp.float32)
    y = _ln_f32(x, g_ref[...].astype(jnp.float32), b_ref[...].astype(jnp.float32), eps)
    y = y.astype(x_ref.dtype)
    out = jnp.dot(y, w_ref[...], preferred_element_type=jnp.float32) \
        + bias_ref[...].astype(jnp.float32)
    o_ref[...] = out.astype(o_ref.dtype)


def _kv_kernel(f_ref, wk_ref, bk_ref, wv_ref, bv_ref, k_ref, v_ref):
    # one pass over feats tile -> both K and V projections
    f = f_ref[...]
    k = jnp.dot(f, wk_ref[...], preferred_element_type=jnp.float32) \
        + bk_ref[...].astype(jnp.float32)
    v = jnp.dot(f, wv_ref[...], preferred_element_type=jnp.float32) \
        + bv_ref[...].astype(jnp.float32)
    k_ref[...] = k.astype(k_ref.dtype)
    v_ref[...] = v.astype(v_ref.dtype)


def _attention_core(q, k, v, bias, h, scale):
    # q: (Lq, D), k/v: (Lk, D), bias: (bH, Lq, Lk) or None;  D = h*dk
    Lq, D = q.shape
    Lk = k.shape[0]
    dk = D // h
    qh = (q.astype(jnp.float32) * scale).reshape(Lq, h, dk)   # scale folded into q
    kh = k.astype(jnp.float32).reshape(Lk, h, dk)
    vh = v.astype(jnp.float32).reshape(Lk, h, dk)
    scores = jnp.einsum("qhd,khd->hqk", qh, kh,
                        preferred_element_type=jnp.float32)    # (h, Lq, Lk)
    if bias is not None:
        scores = scores + bias.astype(jnp.float32)             # bH broadcasts if 1
    m = jnp.max(scores, axis=-1, keepdims=True)
    p = jnp.exp(scores - m)
    denom = jnp.sum(p, axis=-1, keepdims=True)
    p = p * pl.reciprocal(denom)
    ctx = jnp.einsum("hqk,khd->qhd", p, vh,
                     preferred_element_type=jnp.float32)       # (Lq, h, dk)
    return ctx.reshape(Lq, D)


def _attention_bias_kernel(q_ref, k_ref, v_ref, bias_ref, o_ref, *, h, scale):
    ctx = _attention_core(q_ref[0], k_ref[0], v_ref[0], bias_ref[0], h, scale)
    o_ref[0] = ctx.astype(o_ref.dtype)


def _attention_nobias_kernel(q_ref, k_ref, v_ref, o_ref, *, h, scale):
    ctx = _attention_core(q_ref[0], k_ref[0], v_ref[0], None, h, scale)
    o_ref[0] = ctx.astype(o_ref.dtype)


def _attn_out_ffn1_kernel(ctx_ref, res_ref, wo_ref, bo_ref, g_ref, bt_ref,
                          w1_ref, b1_ref, x_ref, h1_ref, *, eps):
    # x_new = residual + ctx @ wo + bo
    x = jnp.dot(ctx_ref[...], wo_ref[...], preferred_element_type=jnp.float32) \
        + bo_ref[...].astype(jnp.float32) + res_ref[...].astype(jnp.float32)
    x_ref[...] = x.astype(x_ref.dtype)
    # h1 = relu(LN2(x_new) @ w1 + b1)
    y = _ln_f32(x, g_ref[...].astype(jnp.float32), bt_ref[...].astype(jnp.float32), eps)
    y = y.astype(ctx_ref.dtype)
    h1 = jnp.dot(y, w1_ref[...], preferred_element_type=jnp.float32) \
        + b1_ref[...].astype(jnp.float32)
    h1_ref[...] = jnp.maximum(h1, 0.0).astype(h1_ref.dtype)


def _linear_residual_kernel(x_ref, w_ref, b_ref, r_ref, o_ref):
    y = jnp.dot(x_ref[...], w_ref[...], preferred_element_type=jnp.float32) \
        + b_ref[...].astype(jnp.float32) + r_ref[...].astype(jnp.float32)
    o_ref[...] = y.astype(o_ref.dtype)


# ------------------------------ wrappers ------------------------------------

_PARALLEL1 = pltpu.CompilerParams(dimension_semantics=("parallel",))


def ln_linear(x2d, g, bt, w, b, eps=1e-6):
    n, din = x2d.shape
    dout = w.shape[1]
    tm = _row_tile(n)
    row = lambda i: (i, 0)
    const = lambda i: (0, 0)
    return pl.pallas_call(
        partial(_ln_linear_kernel, eps=eps),
        out_shape=jax.ShapeDtypeStruct((n, dout), x2d.dtype),
        grid=(pl.cdiv(n, tm),),
        in_specs=[
            pl.BlockSpec((tm, din), row),
            pl.BlockSpec((1, din), const),
            pl.BlockSpec((1, din), const),
            pl.BlockSpec((din, dout), const),
            pl.BlockSpec((1, dout), const),
        ],
        out_specs=pl.BlockSpec((tm, dout), row),
        compiler_params=_PARALLEL1,
    )(x2d, g, bt, w, b)


def kv_proj(f2d, wk, bk, wv, bv):
    n, din = f2d.shape
    dout = wk.shape[1]
    tm = _row_tile(n)
    row = lambda i: (i, 0)
    const = lambda i: (0, 0)
    return pl.pallas_call(
        _kv_kernel,
        out_shape=(jax.ShapeDtypeStruct((n, dout), f2d.dtype),
                   jax.ShapeDtypeStruct((n, dout), f2d.dtype)),
        grid=(pl.cdiv(n, tm),),
        in_specs=[
            pl.BlockSpec((tm, din), row),
            pl.BlockSpec((din, dout), const),
            pl.BlockSpec((1, dout), const),
            pl.BlockSpec((din, dout), const),
            pl.BlockSpec((1, dout), const),
        ],
        out_specs=(pl.BlockSpec((tm, dout), row),
                   pl.BlockSpec((tm, dout), row)),
        compiler_params=_PARALLEL1,
    )(f2d, wk, bk, wv, bv)


def attention(q, k, v, bias, h):
    # q: (B, Lq, D), k/v: (B, Lk, D), bias: broadcastable (bB, bH, Lq, Lk) or None
    B, Lq, D = q.shape
    Lk = k.shape[1]
    scale = 1.0 / math.sqrt(D // h)

    in_specs = [
        pl.BlockSpec((1, Lq, D), lambda b: (b, 0, 0)),
        pl.BlockSpec((1, Lk, D), lambda b: (b, 0, 0)),
        pl.BlockSpec((1, Lk, D), lambda b: (b, 0, 0)),
    ]
    args = [q, k, v]
    if bias is not None:
        bias = jnp.asarray(bias)
        bB, bH = bias.shape[0], bias.shape[1]
        bias_map = (lambda b: (b, 0, 0, 0)) if bB != 1 else (lambda b: (0, 0, 0, 0))
        in_specs.append(pl.BlockSpec((1, bH, Lq, Lk), bias_map))
        args.append(bias)
        kernel = partial(_attention_bias_kernel, h=h, scale=scale)
    else:
        kernel = partial(_attention_nobias_kernel, h=h, scale=scale)

    return pl.pallas_call(
        kernel,
        out_shape=jax.ShapeDtypeStruct((B, Lq, D), q.dtype),
        grid=(B,),
        in_specs=in_specs,
        out_specs=pl.BlockSpec((1, Lq, D), lambda b: (b, 0, 0)),
        compiler_params=_PARALLEL1,
    )(*args)


def attn_out_ffn1(ctx2d, res2d, wo, bo, g, bt, w1, b1, eps=1e-6):
    n, d = ctx2d.shape
    dff = w1.shape[1]
    tm = _row_tile(n)
    row = lambda i: (i, 0)
    const = lambda i: (0, 0)
    return pl.pallas_call(
        partial(_attn_out_ffn1_kernel, eps=eps),
        out_shape=(jax.ShapeDtypeStruct((n, d), ctx2d.dtype),
                   jax.ShapeDtypeStruct((n, dff), ctx2d.dtype)),
        grid=(pl.cdiv(n, tm),),
        in_specs=[
            pl.BlockSpec((tm, d), row),      # ctx
            pl.BlockSpec((tm, d), row),      # residual
            pl.BlockSpec((d, d), const),     # wo
            pl.BlockSpec((1, d), const),     # bo
            pl.BlockSpec((1, d), const),     # ln2 gamma
            pl.BlockSpec((1, d), const),     # ln2 beta
            pl.BlockSpec((d, dff), const),   # w1
            pl.BlockSpec((1, dff), const),   # b1
        ],
        out_specs=(pl.BlockSpec((tm, d), row),
                   pl.BlockSpec((tm, dff), row)),
        compiler_params=_PARALLEL1,
    )(ctx2d, res2d, wo, bo, g, bt, w1, b1)


def linear_residual(x2d, w, b, res2d):
    n, din = x2d.shape
    dout = w.shape[1]
    tm = _row_tile(n)
    row = lambda i: (i, 0)
    const = lambda i: (0, 0)
    return pl.pallas_call(
        _linear_residual_kernel,
        out_shape=jax.ShapeDtypeStruct((n, dout), res2d.dtype),
        grid=(pl.cdiv(n, tm),),
        in_specs=[
            pl.BlockSpec((tm, din), row),
            pl.BlockSpec((din, dout), const),
            pl.BlockSpec((1, dout), const),
            pl.BlockSpec((tm, dout), row),
        ],
        out_specs=pl.BlockSpec((tm, dout), row),
        compiler_params=_PARALLEL1,
    )(x2d, w, b, res2d)


# --------------------------- parameter setup ---------------------------------

def init_params(key, d_model, d_ff, h):
    keys = jax.random.split(key, 12)

    def lin(kw, kb, din, dout):
        bound = 1.0 / math.sqrt(din)
        w = jax.random.uniform(kw, (din, dout), jnp.float32, -bound, bound)
        b = jax.random.uniform(kb, (1, dout), jnp.float32, -bound, bound)
        return w, b

    p = {}
    p["wq"], p["bq"] = lin(keys[0], keys[1], d_model, d_model)
    p["wk"], p["bk"] = lin(keys[2], keys[3], d_model, d_model)
    p["wv"], p["bv"] = lin(keys[4], keys[5], d_model, d_model)
    p["wo"], p["bo"] = lin(keys[6], keys[7], d_model, d_model)
    p["w1"], p["b1"] = lin(keys[8], keys[9], d_model, d_ff)
    p["w2"], p["b2"] = lin(keys[10], keys[11], d_ff, d_model)
    p["ln1_g"] = jnp.ones((1, d_model), jnp.float32)
    p["ln1_b"] = jnp.zeros((1, d_model), jnp.float32)
    p["ln2_g"] = jnp.ones((1, d_model), jnp.float32)
    p["ln2_b"] = jnp.zeros((1, d_model), jnp.float32)
    return p


# ------------------------------- forward -------------------------------------

def kg_mha_ff_forward(p, x, feats, bias, h, eps=1e-6):
    # x: (B, Lq, D), feats: (B, Lk, D), bias: (B/1, h/1, Lq, Lk) or None
    B, Lq, D = x.shape
    Lk = feats.shape[1]

    x2d = x.reshape(B * Lq, D)
    f2d = feats.reshape(B * Lk, D)

    # sublayer[0]: x + self_attn(LN1(x), feats, feats, bias)
    q2d = ln_linear(x2d, p["ln1_g"], p["ln1_b"], p["wq"], p["bq"], eps=eps)
    k2d, v2d = kv_proj(f2d, p["wk"], p["bk"], p["wv"], p["bv"])

    q = q2d.reshape(B, Lq, D)          # head-interleaved (B, L, h*dk) layout;
    k = k2d.reshape(B, Lk, D)          # head split happens inside the kernel,
    v = v2d.reshape(B, Lk, D)          # so no transposes through HBM.

    ctx2d = attention(q, k, v, bias, h).reshape(B * Lq, D)

    # out-proj + residual, then sublayer[1] first half: relu(LN2(x)@w1 + b1)
    x2d_new, h1 = attn_out_ffn1(ctx2d, x2d, p["wo"], p["bo"],
                                p["ln2_g"], p["ln2_b"], p["w1"], p["b1"], eps=eps)
    # sublayer[1] second half: x + h1 @ w2 + b2
    out2d = linear_residual(h1, p["w2"], p["b2"], x2d_new)
    return out2d.reshape(B, Lq, D)


# ----------------------- pure-JAX reference (check) ---------------------------

def reference_forward(p, x, feats, bias, h):
    def ln(x, g, b, eps=1e-6):
        mean = jnp.mean(x, axis=-1, keepdims=True)
        var = jnp.sum((x - mean) ** 2, -1, keepdims=True) / (x.shape[-1] - 1)
        return g[0] * (x - mean) / (jnp.sqrt(var) + eps) + b[0]

    B, Lq, D = x.shape
    Lk = feats.shape[1]
    dk = D // h
    if bias is None:
        bias = jnp.zeros((B, h, Lq, Lk), x.dtype)
    y = ln(x, p["ln1_g"], p["ln1_b"])
    q = (y @ p["wq"] + p["bq"][0]).reshape(B, Lq, h, dk).transpose(0, 2, 1, 3)
    k = (feats @ p["wk"] + p["bk"][0]).reshape(B, Lk, h, dk).transpose(0, 2, 1, 3)
    v = (feats @ p["wv"] + p["bv"][0]).reshape(B, Lk, h, dk).transpose(0, 2, 1, 3)
    s = jnp.einsum("bhqd,bhkd->bhqk", q, k) / math.sqrt(dk) + bias
    pattn = jax.nn.softmax(s, axis=-1)
    ctx = jnp.einsum("bhqk,bhkd->bhqd", pattn, v).transpose(0, 2, 1, 3).reshape(B, Lq, D)
    x = x + (ctx @ p["wo"] + p["bo"][0])
    y = ln(x, p["ln2_g"], p["ln2_b"])
    x = x + (jnp.maximum(y @ p["w1"] + p["b1"][0], 0.0) @ p["w2"] + p["b2"][0])
    return x


# --------------------------------- main ---------------------------------------

if __name__ == "__main__":
    B, Lq, Lk = 2, 8, 8
    d_model, d_ff, h = 32, 64, 4

    key = jax.random.PRNGKey(0)
    kx, kf, kb, kp = jax.random.split(key, 4)
    x = jax.random.normal(kx, (B, Lq, d_model), jnp.float32)
    feats = jax.random.normal(kf, (B, Lk, d_model), jnp.float32)
    bias = 0.1 * jax.random.normal(kb, (B, h, Lq, Lk), jnp.float32)

    params = init_params(kp, d_model, d_ff, h)

    # with bias
    out = jax.block_until_ready(kg_mha_ff_forward(params, x, feats, bias, h))
    ref = reference_forward(params, x, feats, bias, h)
    assert out.shape == (B, Lq, d_model)
    assert jnp.allclose(out, ref, atol=1e-4, rtol=1e-4), "mismatch vs reference (bias)"

    # bias=None path (no-bias kernel variant, no zero tensor materialized)
    out_nb = jax.block_until_ready(kg_mha_ff_forward(params, x, feats, None, h))
    ref_nb = reference_forward(params, x, feats, None, h)
    assert jnp.allclose(out_nb, ref_nb, atol=1e-4, rtol=1e-4), "mismatch vs reference (no bias)"

    print("KERNEL_OK")
</pallas_src>

<mosaic_0001>
module attributes {stable_mosaic.version = 11 : i64} {
  func.func @_ln_linear_kernel(%arg0: i32, %arg1: memref<16x32xf32, #tpu.memory_space<vmem>>, %arg2: memref<1x32xf32, #tpu.memory_space<vmem>>, %arg3: memref<1x32xf32, #tpu.memory_space<vmem>>, %arg4: memref<32x32xf32, #tpu.memory_space<vmem>>, %arg5: memref<1x32xf32, #tpu.memory_space<vmem>>, %arg6: memref<16x32xf32, #tpu.memory_space<vmem>>) attributes {dimension_semantics = [#tpu.dimension_semantics<parallel>], iteration_bounds = array<i64: 1>, scalar_prefetch = 0 : i64, scratch_operands = 0 : i64, tpu.core_type = #tpu.core_type<tc>, window_params = [{transform_indices = @transform_0, window_bounds = array<i64: 16, 32>}, {pipeline_mode = #tpu.pipeline_mode<synchronous>, transform_indices = @transform_1, window_bounds = array<i64: 1, 32>}, {pipeline_mode = #tpu.pipeline_mode<synchronous>, transform_indices = @transform_2, window_bounds = array<i64: 1, 32>}, {pipeline_mode = #tpu.pipeline_mode<synchronous>, transform_indices = @transform_3, window_bounds = array<i64: 32, 32>}, {pipeline_mode = #tpu.pipeline_mode<synchronous>, transform_indices = @transform_4, window_bounds = array<i64: 1, 32>}, {transform_indices = @transform_5, window_bounds = array<i64: 16, 32>}]} {
    %c0 = arith.constant 0 : index
    %c0_0 = arith.constant 0 : index
    %0 = vector.load %arg1[%c0, %c0_0] : memref<16x32xf32, #tpu.memory_space<vmem>>, vector<16x32xf32>
    %c0_1 = arith.constant 0 : index
    %c0_2 = arith.constant 0 : index
    %1 = vector.load %arg2[%c0_1, %c0_2] : memref<1x32xf32, #tpu.memory_space<vmem>>, vector<1x32xf32>
    %c0_3 = arith.constant 0 : index
    %c0_4 = arith.constant 0 : index
    %2 = vector.load %arg3[%c0_3, %c0_4] : memref<1x32xf32, #tpu.memory_space<vmem>>, vector<1x32xf32>
    %cst = arith.constant dense<0.000000e+00> : vector<16xf32>
    %3 = vector.multi_reduction <add>, %0, %cst [1] : vector<16x32xf32> to vector<16xf32>
    %4 = vector.shape_cast %3 : vector<16xf32> to vector<16x1xf32>
    %cst_5 = arith.constant 3.200000e+01 : f32
    %5 = vector.broadcast %cst_5 : f32 to vector<16x1xf32>
    %6 = arith.divf %4, %5 : vector<16x1xf32>
    %7 = vector.broadcast %6 : vector<16x1xf32> to vector<16x32xf32>
    %8 = arith.subf %0, %7 : vector<16x32xf32>
    %9 = arith.mulf %8, %8 : vector<16x32xf32>
    %cst_6 = arith.constant dense<0.000000e+00> : vector<16xf32>
    %10 = vector.multi_reduction <add>, %9, %cst_6 [1] : vector<16x32xf32> to vector<16xf32>
    %11 = vector.shape_cast %10 : vector<16xf32> to vector<16x1xf32>
    %cst_7 = arith.constant 3.100000e+01 : f32
    %12 = vector.broadcast %cst_7 : f32 to vector<16x1xf32>
    %13 = arith.divf %11, %12 : vector<16x1xf32>
    %14 = vector.broadcast %6 : vector<16x1xf32> to vector<16x32xf32>
    %15 = arith.subf %0, %14 : vector<16x32xf32>
    %16 = vector.broadcast %1 : vector<1x32xf32> to vector<16x32xf32>
    %17 = arith.mulf %16, %15 : vector<16x32xf32>
    %18 = math.sqrt %13 : vector<16x1xf32>
    %cst_8 = arith.constant 9.99999997E-7 : f32
    %19 = vector.broadcast %cst_8 : f32 to vector<16x1xf32>
    %20 = arith.addf %18, %19 : vector<16x1xf32>
    %21 = vector.broadcast %20 : vector<16x1xf32> to vector<16x32xf32>
    %22 = arith.divf %17, %21 : vector<16x32xf32>
    %23 = vector.broadcast %2 : vector<1x32xf32> to vector<16x32xf32>
    %24 = arith.addf %22, %23 : vector<16x32xf32>
    %c0_9 = arith.constant 0 : index
    %c0_10 = arith.constant 0 : index
    %25 = vector.load %arg4[%c0_9, %c0_10] : memref<32x32xf32, #tpu.memory_space<vmem>>, vector<32x32xf32>
    %cst_11 = arith.constant dense<0.000000e+00> : vector<16x32xf32>
    %26 = tpu.matmul %24, %25, %cst_11 {dimension_numbers = #tpu.dot_dimension_numbers<[1], [0], [0], [1], [0, 0, 1, 1], [], []>} : vector<16x32xf32>, vector<32x32xf32>, vector<16x32xf32> -> vector<16x32xf32>
    %c0_12 = arith.constant 0 : index
    %c0_13 = arith.constant 0 : index
    %27 = vector.load %arg5[%c0_12, %c0_13] : memref<1x32xf32, #tpu.memory_space<vmem>>, vector<1x32xf32>
    %28 = vector.broadcast %27 : vector<1x32xf32> to vector<16x32xf32>
    %29 = arith.addf %26, %28 : vector<16x32xf32>
    %c0_14 = arith.constant 0 : index
    %c0_15 = arith.constant 0 : index
    %30 = vector.load %arg6[%c0_14, %c0_15] : memref<16x32xf32, #tpu.memory_space<vmem>>, vector<16x32xf32>
    tpu.vector_store %arg6[%c0_14, %c0_15], %29 {strides = array<i32>} : memref<16x32xf32, #tpu.memory_space<vmem>>, vector<16x32xf32>,
    return
  }
  func.func @transform_0(%arg0: i32) -> (i32, i32) {
    %c0_i32 = arith.constant 0 : i32
    %c0_i32_0 = arith.constant 0 : i32
    return %arg0, %c0_i32 : i32, i32
  }
  func.func @transform_1(%arg0: i32) -> (i32, i32) {
    %c0_i32 = arith.constant 0 : i32
    %c0_i32_0 = arith.constant 0 : i32
    %c0_i32_1 = arith.constant 0 : i32
    return %c0_i32, %c0_i32_0 : i32, i32
  }
  func.func @transform_2(%arg0: i32) -> (i32, i32) {
    %c0_i32 = arith.constant 0 : i32
    %c0_i32_0 = arith.constant 0 : i32
    %c0_i32_1 = arith.constant 0 : i32
    return %c0_i32, %c0_i32_0 : i32, i32
  }
  func.func @transform_3(%arg0: i32) -> (i32, i32) {
    %c0_i32 = arith.constant 0 : i32
    %c0_i32_0 = arith.constant 0 : i32
    %c0_i32_1 = arith.constant 0 : i32
    return %c0_i32, %c0_i32_0 : i32, i32
  }
  func.func @transform_4(%arg0: i32) -> (i32, i32) {
    %c0_i32 = arith.constant 0 : i32
    %c0_i32_0 = arith.constant 0 : i32
    %c0_i32_1 = arith.constant 0 : i32
    return %c0_i32, %c0_i32_0 : i32, i32
  }
  func.func @transform_5(%arg0: i32) -> (i32, i32) {
    %c0_i32 = arith.constant 0 : i32
    %c0_i32_0 = arith.constant 0 : i32
    return %arg0, %c0_i32 : i32, i32
  }
}

</mosaic_0001>

<bundles_post_ra>
// kernel: tpu_custom_call.1
= control target key start
LH: loop header
LB: loop body
LE: loop exit
PB: predicated region body
PF: predicated region fallthrough
CT: control target
= control target key end

     0   :  { %10 = vsyncpa [#allocation3], 0  ;;  %s395_s0 = inlined_call_operand.hbm [shape: f32[16,32], index: 0, kind: input, shape index: {}]   ;;  %s396_s1 = inlined_call_operand.vmem [shape: f32[1,32], index: 1, kind: input, shape index: {}]   ;;  %s397_s2 = inlined_call_operand.vmem [shape: f32[1,32], index: 2, kind: input, shape index: {}]   ;;  %s398_s3 = inlined_call_operand.hbm [shape: f32[32,32], index: 3, kind: input, shape index: {}]   ;;  %s399_s4 = inlined_call_operand.vmem [shape: f32[1,32], index: 4, kind: input, shape index: {}]   ;;  %s400_s5 = inlined_call_operand.hbm [shape: f32[16,32], index: 5, kind: output, shape index: {}]  }
   0x1   :  { %11 = vsyncpa [#allocation6], 0 }
   0x2   :  { %12 = vsyncpa [#allocation4], 0  ;;  %s325_s18 = smov [#allocation2]  }
   0x3   :  { %s18_s19 = sshll.u32 %s325_s18, 4  ;;  %s19_s19 = int_to_ptr.vmem [resolvable:$true] %s18_s19 }
   0x4   :  { %s267_s20 = scalar_lea.vmem %s19_s19, 256  ;;  %p272_p1 = scmp.lt.s32.totalorder %s19_s19, %s19_s19 }
   0x5   :  { %p268_p0 = scmp.ne.s32.totalorder %s19_s19, %s267_s20  ;;  %p273_p2 = scmp.lt.s32.totalorder %s267_s20, %s267_s20 }
   0x7   :  { %p274_p3 = por %p273_p2, %p272_p1 }
   0x9   :  { %p275_p4 = pnand %p274_p3, %p268_p0 }
   0xb   :  { %278 = shalt.err (!%p275_p4)
}
   0xc   :  { %s326_s21 = smov 128   ;;  %s327_s22 = smov 8  }
   0xd   :  { %24 = dma.hbm_to_vmem [thread:$0]  %s395_s0, 256, %s19_s19, [#allocation3], %s326_s21, %s326_s21, %s327_s22  }
   0xe   :  { %s328_s25 = smov [#allocation5]  }
   0xf   :  { %s34_s26 = sshll.u32 %s328_s25, 4  ;;  %s35_s26 = int_to_ptr.vmem [resolvable:$true] %s34_s26 }
  0x10   :  { %s287_s27 = scalar_lea.vmem %s35_s26, 512  ;;  %p292_p6 = scmp.lt.s32.totalorder %s35_s26, %s35_s26 }
  0x11   :  { %p288_p5 = scmp.ne.s32.totalorder %s35_s26, %s287_s27  ;;  %p293_p7 = scmp.lt.s32.totalorder %s287_s27, %s287_s27 }
  0x13   :  { %p294_p8 = por %p293_p7, %p292_p6 }
  0x15   :  { %p295_p9 = pnand %p294_p8, %p288_p5 }
  0x17   :  { %298 = shalt.err (!%p295_p9)
}
  0x18   :  { %40 = dma.hbm_to_vmem [thread:$0]  %s398_s3, 512, %s35_s26, [#allocation6], %s326_s21, %s326_s21, %s327_s22  }
  0x19   :  { %319 = dma.done.wait [#allocation3], 256  }
  0x1a   :  { %320 = vsyncadd [#allocation3], 4294967040 }
  0x1b   :  { %321 = dma.done.wait [#allocation6], 512  }
  0x1c   :  { %322 = vsyncadd [#allocation6], 4294966784  ;;  %vm53_vm0 = vcmask 261120   ;;  %v49_v0 = vld [vmem:[#allocation2] sm:$0xff]  ;;  %v50_v1 = vld [vmem:[#allocation2 + $0x8] sm:$0xff] }
  0x1d   :  { %v54_v2 = vsel %vm53_vm0, %v49_v0, 0.0  ;;  %v57_v3 = vsel %vm53_vm0, %v50_v1, 0.0  ;;  %v115_v14 = vld [vmem:[#allocation5 + $0x18] sm:$0xff]  ;;  %v114_v15 = vld [vmem:[#allocation5 + $0x10] sm:$0xff]  ;;  %v113_v16 = vld [vmem:[#allocation5 + $0x8] sm:$0xff] }
  0x1e   :  { %55 = vadd.xlane.f32.xlu0 %v54_v2  ;;  %235 = vmatprep.subr.mxu0 %v115_v14  ;;  %v112_v17 = vld [vmem:[#allocation5] sm:$0xff]  ;;  %v224_v34 = vld [vmem:[%s396_s1] ss:$0 sm:$0xff]  ;;  %s329_s1 = smov [#allocation7]  }
  0x1f   :  { %236 = vmatpush3.msra.mxu0 %v115_v14  ;;  %v225_v37 = vld [vmem:[%s397_s2] ss:$0 sm:$0xff]  ;;  %s211_s9 = sshll.u32 %s329_s1, 4  ;;  %s212_s9 = int_to_ptr.vmem [resolvable:$true] %s211_s9 }
  0x20   :  { %237 = vmatprep.subr.mxu0 %v114_v15  ;;  %v226_v44 = vld [vmem:[%s399_s4] ss:$0 sm:$0xff]  ;;  %s299_s2 = scalar_lea.vmem %s212_s9, 256  ;;  %p304_p11 = scmp.lt.s32.totalorder %s212_s9, %s212_s9 }
  0x21   :  { %238 = vmatpush3.msra.mxu0 %v114_v15  ;;  %p300_p10 = scmp.ne.s32.totalorder %s212_s9, %s299_s2  ;;  %p305_p12 = scmp.lt.s32.totalorder %s299_s2, %s299_s2 }
  0x22   :  { %58 = vadd.xlane.f32.xlu0 %v57_v3  ;;  %239 = vmatprep.subr.mxu0 %v113_v16 }
  0x23   :  { %240 = vmatpush3.msra.mxu0 %v113_v16  ;;  %p306_p13 = por %p305_p12, %p304_p11 }
  0x24   :  { %241 = vmatprep.subr.mxu0 %v112_v17 }
  0x25   :  { %242 = vmatpush3.msra.mxu0 %v112_v17  ;;  %p307_p0 = pnand %p306_p13, %p300_p10 }
  0xa7   :  { %v56_v4 = vpop.xlane.xlu0 %55 }
  0xa8   :  { %v61_v5 = vmul.f32 0.03125, %v56_v4 }
  0xaa   :  { %v63_v6 = vsub.f32 %v49_v0, %v61_v5 }
  0xab   :  { %v59_v7 = vpop.xlane.xlu0 %58 }
  0xac   :  { %v62_v8 = vmul.f32 0.03125, %v59_v7  ;;  %v65_v9 = vmul.f32 %v63_v6, %v63_v6  ;;  %v82_v35 = vmul.f32 %v224_v34, %v63_v6 }
  0xae   :  { %v64_v10 = vsub.f32 %v50_v1, %v62_v8  ;;  %v67_v11 = vsel %vm53_vm0, %v65_v9, 0.0 }
  0xaf   :  { %68 = vadd.xlane.f32.xlu1 %v67_v11 }
  0xb0   :  { %v66_v12 = vmul.f32 %v64_v10, %v64_v10  ;;  %v83_v39 = vmul.f32 %v224_v34, %v64_v10 }
  0xb2   :  { %v70_v13 = vsel %vm53_vm0, %v66_v12, 0.0 }
  0xb3   :  { %71 = vadd.xlane.f32.xlu1 %v70_v13 }
 0x138   :  { %v69_v18 = vpop.xlane.xlu1 %68 }
 0x139   :  { %v74_v19 = vmul.f32 0.032258064, %v69_v18 }
 0x13b   :  { %251 = vrsqrt.f32 %v74_v19  ;;  %vm86_vm1 = vcmp.eq.f32.partialorder %v74_v19, inf  ;;  %v89_v24 = vand.u32 2147483648, %v74_v19  ;;  %vm88_vm2 = vcmp.eq.f32.partialorder %v74_v19, 0.0 }
 0x13c   :  { %v72_v20 = vpop.xlane.xlu1 %71 }
 0x13d   :  { %v75_v21 = vmul.f32 0.032258064, %v72_v20 }
 0x13f   :  { %253 = vrsqrt.f32 %v75_v21  ;;  %vm93_vm3 = vcmp.eq.f32.partialorder %v75_v21, inf  ;;  %v96_v30 = vand.u32 2147483648, %v75_v21  ;;  %vm95_vm4 = vcmp.eq.f32.partialorder %v75_v21, 0.0 }
 0x148   :  { %v252_v22 = vpop.eup %251 }
 0x149   :  { %v85_v23 = vmul.f32 %v252_v22, %v74_v19 }
 0x14b   :  { %v87_v25 = vsel %vm86_vm1, %v74_v19, %v85_v23 }
 0x14c   :  { %v254_v26 = vpop.eup %253  ;;  %v90_v27 = vsel %vm88_vm2, %v89_v24, %v87_v25 }
 0x14d   :  { %v92_v28 = vmul.f32 %v254_v26, %v75_v21  ;;  %v98_v29 = vadd.f32 1e-06, %v90_v27 }
 0x14f   :  { %v94_v31 = vsel %vm93_vm3, %v75_v21, %v92_v28  ;;  %255 = vrcp.f32 %v98_v29 }
 0x150   :  { %v97_v32 = vsel %vm95_vm4, %v96_v30, %v94_v31 }
 0x151   :  { %v99_v33 = vadd.f32 1e-06, %v97_v32 }
 0x153   :  { %257 = vrcp.f32 %v99_v33 }
 0x15c   :  { %v256_v36 = vpop.eup %255 }
 0x15d   :  { %v101_v38 = vmul.f32 %v256_v36, %v82_v35 }
 0x15f   :  { %v110_v40 = vadd.f32 %v225_v37, %v101_v38 }
 0x160   :  { %v258_v41 = vpop.eup %257 }
 0x161   :  { %v103_v42 = vmul.f32 %v258_v41, %v83_v39  ;;  %243 = vmatprep.mubr.msk.f32.mxu0 %vm53_vm0, %v110_v40 }
 0x163   :  { %v111_v43 = vadd.f32 %v225_v37, %v103_v42 }
 0x165   :  { %244 = vmatmul.mubr.msk.f32.vlgmr.msra.gmra.mxu0 %vm53_vm0, %v111_v43 }
 0x225   :  { %v245_v45 = vpop.f32.mrf.mxu0 }
 0x226   :  { %v201_v46 = vadd.f32 %v245_v45, %v226_v44 }
 0x227   :  { %v195_v47 = vpop.f32.mrf.mxu0 }
 0x228   :  { %205 = vst.msk [vmem:[#allocation7 + $0x8] sm:$0xff] %vm53_vm0, %v201_v46  ;;  %v196_v48 = vadd.f32 %v226_v44, %v195_v47 }
 0x22a   :  { %204 = vst.msk [vmem:[#allocation7] sm:$0xff] %vm53_vm0, %v196_v48 }
 0x22b   :  { %310 = shalt.err (!%p307_p0)
}
 0x22c   :  { %217 = dma.vmem_to_hbm [thread:$0]  %s212_s9, 256, %s400_s5, [#allocation4], %s326_s21, %s326_s21, %s327_s22  }
 0x22d   :  { %323 = dma.done.wait [#allocation4], 256  }
 0x22e   :  { %324 = vsyncadd [#allocation4], 4294967040 }
 0x22f   :  { %221 = vsyncpa [#allocation3], 1 }
 0x230   :  { %222 = vsyncpa [#allocation6], 1 }
 0x231   :  { %223 = vsyncpa [#allocation4], 1 }

</bundles_post_ra>
